<compile_context>
chip_gen: v7x
topology: tpu7x:2x2x1
jax: 0.10.0
libtpu: 0.0.40
codegen_flags: <defaults>
</compile_context>

<pallas_src>
import functools

import jax
import jax.numpy as jnp
from jax.experimental import pallas as pl
from jax.experimental.pallas import tpu as pltpu

_LANE = 128     # last-dim tile (vreg lanes)
_SUBLANE = 8    # second-to-last-dim tile (vreg sublanes)


def _round_up(v, m):
    return ((v + m - 1) // m) * m


def _pad2d(a, rows, cols):
    r, c = a.shape
    return jnp.pad(a, ((0, rows - r), (0, cols - c)))


def _a2c_net_kernel(x_ref, w1_ref, b1_ref, w2_ref, b2_ref, wh_ref, bh_ref,
                    out_ref):
    """out = (relu(relu(x@W1+b1)@W2+b2)) @ [Wa|Wc] + [ba|bc]  (all lane-dense)."""
    w_dtype = w1_ref.dtype
    x = x_ref[...].astype(w_dtype)

    # h1 = relu(x @ W1 + b1)   -- accumulate + bias + relu in f32.
    h1 = jnp.dot(x, w1_ref[...], preferred_element_type=jnp.float32) + b1_ref[...]
    h1 = jnp.maximum(h1, 0.0)

    # h2 = relu(h1 @ W2 + b2)
    h2 = jnp.dot(h1.astype(w_dtype), w2_ref[...],
                 preferred_element_type=jnp.float32) + b2_ref[...]
    h2 = jnp.maximum(h2, 0.0)

    # Fused heads: columns [0:n_out) = actor logits, column n_out = critic value.
    heads = jnp.dot(h2.astype(w_dtype), wh_ref[...],
                    preferred_element_type=jnp.float32) + bh_ref[...]
    out_ref[...] = heads.astype(out_ref.dtype)


@functools.partial(jax.jit, static_argnames=("use_bf16",))
def a2c_net_forward(x, params, use_bf16=False):
    """Forward pass of the A2C Net. Returns (critic_output, actor_output).

    Weights are stored as (in_features, out_features) (transposed from
    PyTorch's nn.Linear), so the kernel computes x @ W + b.
    """
    w1, b1, w2, b2, wa, ba, wc, bc = params
    B, n_in = x.shape
    n_mid = w1.shape[1]
    n_out = wa.shape[1]
    n_heads = n_out + 1  # [actor logits | critic value]

    # ---- Fuse actor + critic into one lane-dense head matmul. ----
    w_heads = jnp.concatenate([wa, wc], axis=1)     # (n_mid, n_out + 1)
    b_heads = jnp.concatenate([ba, bc], axis=1)     # (1,     n_out + 1)

    # ---- Pad to TPU tile granularity (zero padding is exact here). ----
    n_in_p = _round_up(n_in, _LANE)
    n_mid_p = _round_up(n_mid, _LANE)
    n_heads_p = _round_up(n_heads, _LANE)

    # Batch tile: big (256-row) tiles when the batch is large, otherwise one
    # sublane-aligned tile covering the whole (padded) batch.
    TB = 256 if B >= 256 else _round_up(B, _SUBLANE)
    B_p = _round_up(B, TB)
    grid = (B_p // TB,)

    w_dtype = jnp.bfloat16 if use_bf16 else jnp.float32
    x_p = _pad2d(x, B_p, n_in_p).astype(w_dtype)
    w1_p = _pad2d(w1, n_in_p, n_mid_p).astype(w_dtype)
    w2_p = _pad2d(w2, n_mid_p, n_mid_p).astype(w_dtype)
    wh_p = _pad2d(w_heads, n_mid_p, n_heads_p).astype(w_dtype)
    b1_p = _pad2d(b1, 1, n_mid_p).astype(jnp.float32)
    b2_p = _pad2d(b2, 1, n_mid_p).astype(jnp.float32)
    bh_p = _pad2d(b_heads, 1, n_heads_p).astype(jnp.float32)

    # Weights/biases stay VMEM-resident across all batch tiles (block idx (0,0)).
    resident = lambda a: pl.BlockSpec(a.shape, lambda i: (0, 0))

    heads_out = pl.pallas_call(
        _a2c_net_kernel,
        out_shape=jax.ShapeDtypeStruct((B_p, n_heads_p), jnp.float32),
        grid=grid,
        in_specs=[
            pl.BlockSpec((TB, n_in_p), lambda i: (i, 0)),   # x: tiled over batch
            resident(w1_p), resident(b1_p),
            resident(w2_p), resident(b2_p),
            resident(wh_p), resident(bh_p),
        ],
        out_specs=pl.BlockSpec((TB, n_heads_p), lambda i: (i, 0)),
        compiler_params=pltpu.CompilerParams(
            dimension_semantics=("parallel",),  # shard batch tiles across TCs
        ),
    )(x_p, w1_p, b1_p, w2_p, b2_p, wh_p, bh_p)

    # Drop padding, split fused heads.
    actor_out = heads_out[:B, :n_out]
    critic_out = heads_out[:B, n_out:n_heads]
    return critic_out, actor_out


def init_params(key, n_in, n_mid, n_out):
    """Deterministic PyTorch-style (uniform +/- 1/sqrt(fan_in)) init."""
    ks = jax.random.split(key, 8)

    def lin(kw, kb, fan_in, fan_out):
        bound = 1.0 / jnp.sqrt(fan_in)
        w = jax.random.uniform(kw, (fan_in, fan_out), jnp.float32, -bound, bound)
        b = jax.random.uniform(kb, (1, fan_out), jnp.float32, -bound, bound)
        return w, b

    w1, b1 = lin(ks[0], ks[1], n_in, n_mid)
    w2, b2 = lin(ks[2], ks[3], n_mid, n_mid)
    wa, ba = lin(ks[4], ks[5], n_mid, n_out)
    wc, bc = lin(ks[6], ks[7], n_mid, 1)
    return (w1, b1, w2, b2, wa, ba, wc, bc)


if __name__ == "__main__":
    key = jax.random.PRNGKey(0)
    B, n_in, n_mid, n_out = 2, 4, 32, 2

    k_x, k_p = jax.random.split(key)
    x = jax.random.normal(k_x, (B, n_in), jnp.float32)
    params = init_params(k_p, n_in, n_mid, n_out)

    critic_out, actor_out = a2c_net_forward(x, params)
    jax.block_until_ready((critic_out, actor_out))

    # Reference check in plain JAX.
    w1, b1, w2, b2, wa, ba, wc, bc = params
    h1 = jnp.maximum(x @ w1 + b1, 0.0)
    h2 = jnp.maximum(h1 @ w2 + b2, 0.0)
    ref_critic = h2 @ wc + bc
    ref_actor = h2 @ wa + ba
    assert critic_out.shape == (B, 1) and actor_out.shape == (B, n_out)
    assert jnp.allclose(critic_out, ref_critic, atol=1e-5)
    assert jnp.allclose(actor_out, ref_actor, atol=1e-5)

    print("KERNEL_OK")
</pallas_src>

<mosaic_0001>
module attributes {stable_mosaic.version = 11 : i64} {
  func.func @_a2c_net_kernel(%arg0: i32, %arg1: memref<8x128xf32, #tpu.memory_space<vmem>>, %arg2: memref<128x128xf32, #tpu.memory_space<vmem>>, %arg3: memref<1x128xf32, #tpu.memory_space<vmem>>, %arg4: memref<128x128xf32, #tpu.memory_space<vmem>>, %arg5: memref<1x128xf32, #tpu.memory_space<vmem>>, %arg6: memref<128x128xf32, #tpu.memory_space<vmem>>, %arg7: memref<1x128xf32, #tpu.memory_space<vmem>>, %arg8: memref<8x128xf32, #tpu.memory_space<vmem>>) attributes {dimension_semantics = [#tpu.dimension_semantics<parallel>], iteration_bounds = array<i64: 1>, scalar_prefetch = 0 : i64, scratch_operands = 0 : i64, tpu.core_type = #tpu.core_type<tc>, window_params = [{transform_indices = @transform_0, window_bounds = array<i64: 8, 128>}, {pipeline_mode = #tpu.pipeline_mode<synchronous>, transform_indices = @transform_1, window_bounds = array<i64: 128, 128>}, {pipeline_mode = #tpu.pipeline_mode<synchronous>, transform_indices = @transform_2, window_bounds = array<i64: 1, 128>}, {pipeline_mode = #tpu.pipeline_mode<synchronous>, transform_indices = @transform_3, window_bounds = array<i64: 128, 128>}, {pipeline_mode = #tpu.pipeline_mode<synchronous>, transform_indices = @transform_4, window_bounds = array<i64: 1, 128>}, {pipeline_mode = #tpu.pipeline_mode<synchronous>, transform_indices = @transform_5, window_bounds = array<i64: 128, 128>}, {pipeline_mode = #tpu.pipeline_mode<synchronous>, transform_indices = @transform_6, window_bounds = array<i64: 1, 128>}, {transform_indices = @transform_7, window_bounds = array<i64: 8, 128>}]} {
    %c0 = arith.constant 0 : index
    %c0_0 = arith.constant 0 : index
    %0 = vector.load %arg1[%c0, %c0_0] : memref<8x128xf32, #tpu.memory_space<vmem>>, vector<8x128xf32>
    %c0_1 = arith.constant 0 : index
    %c0_2 = arith.constant 0 : index
    %1 = vector.load %arg2[%c0_1, %c0_2] : memref<128x128xf32, #tpu.memory_space<vmem>>, vector<128x128xf32>
    %cst = arith.constant dense<0.000000e+00> : vector<8x128xf32>
    %2 = tpu.matmul %0, %1, %cst {dimension_numbers = #tpu.dot_dimension_numbers<[1], [0], [0], [1], [0, 0, 1, 1], [], []>} : vector<8x128xf32>, vector<128x128xf32>, vector<8x128xf32> -> vector<8x128xf32>
    %c0_3 = arith.constant 0 : index
    %c0_4 = arith.constant 0 : index
    %3 = vector.load %arg3[%c0_3, %c0_4] : memref<1x128xf32, #tpu.memory_space<vmem>>, vector<1x128xf32>
    %4 = vector.broadcast %3 : vector<1x128xf32> to vector<8x128xf32>
    %5 = arith.addf %2, %4 : vector<8x128xf32>
    %cst_5 = arith.constant 0.000000e+00 : f32
    %6 = vector.broadcast %cst_5 : f32 to vector<8x128xf32>
    %7 = arith.maximumf %5, %6 : vector<8x128xf32>
    %c0_6 = arith.constant 0 : index
    %c0_7 = arith.constant 0 : index
    %8 = vector.load %arg4[%c0_6, %c0_7] : memref<128x128xf32, #tpu.memory_space<vmem>>, vector<128x128xf32>
    %cst_8 = arith.constant dense<0.000000e+00> : vector<8x128xf32>
    %9 = tpu.matmul %7, %8, %cst_8 {dimension_numbers = #tpu.dot_dimension_numbers<[1], [0], [0], [1], [0, 0, 1, 1], [], []>} : vector<8x128xf32>, vector<128x128xf32>, vector<8x128xf32> -> vector<8x128xf32>
    %c0_9 = arith.constant 0 : index
    %c0_10 = arith.constant 0 : index
    %10 = vector.load %arg5[%c0_9, %c0_10] : memref<1x128xf32, #tpu.memory_space<vmem>>, vector<1x128xf32>
    %11 = vector.broadcast %10 : vector<1x128xf32> to vector<8x128xf32>
    %12 = arith.addf %9, %11 : vector<8x128xf32>
    %cst_11 = arith.constant 0.000000e+00 : f32
    %13 = vector.broadcast %cst_11 : f32 to vector<8x128xf32>
    %14 = arith.maximumf %12, %13 : vector<8x128xf32>
    %c0_12 = arith.constant 0 : index
    %c0_13 = arith.constant 0 : index
    %15 = vector.load %arg6[%c0_12, %c0_13] : memref<128x128xf32, #tpu.memory_space<vmem>>, vector<128x128xf32>
    %cst_14 = arith.constant dense<0.000000e+00> : vector<8x128xf32>
    %16 = tpu.matmul %14, %15, %cst_14 {dimension_numbers = #tpu.dot_dimension_numbers<[1], [0], [0], [1], [0, 0, 1, 1], [], []>} : vector<8x128xf32>, vector<128x128xf32>, vector<8x128xf32> -> vector<8x128xf32>
    %c0_15 = arith.constant 0 : index
    %c0_16 = arith.constant 0 : index
    %17 = vector.load %arg7[%c0_15, %c0_16] : memref<1x128xf32, #tpu.memory_space<vmem>>, vector<1x128xf32>
    %18 = vector.broadcast %17 : vector<1x128xf32> to vector<8x128xf32>
    %19 = arith.addf %16, %18 : vector<8x128xf32>
    %c0_17 = arith.constant 0 : index
    %c0_18 = arith.constant 0 : index
    %20 = vector.load %arg8[%c0_17, %c0_18] : memref<8x128xf32, #tpu.memory_space<vmem>>, vector<8x128xf32>
    tpu.vector_store %arg8[%c0_17, %c0_18], %19 {strides = array<i32>} : memref<8x128xf32, #tpu.memory_space<vmem>>, vector<8x128xf32>,
    return
  }
  func.func @transform_0(%arg0: i32) -> (i32, i32) {
    %c0_i32 = arith.constant 0 : i32
    %c0_i32_0 = arith.constant 0 : i32
    return %arg0, %c0_i32 : i32, i32
  }
  func.func @transform_1(%arg0: i32) -> (i32, i32) {
    %c0_i32 = arith.constant 0 : i32
    %c0_i32_0 = arith.constant 0 : i32
    %c0_i32_1 = arith.constant 0 : i32
    return %c0_i32, %c0_i32_0 : i32, i32
  }
  func.func @transform_2(%arg0: i32) -> (i32, i32) {
    %c0_i32 = arith.constant 0 : i32
    %c0_i32_0 = arith.constant 0 : i32
    %c0_i32_1 = arith.constant 0 : i32
    return %c0_i32, %c0_i32_0 : i32, i32
  }
  func.func @transform_3(%arg0: i32) -> (i32, i32) {
    %c0_i32 = arith.constant 0 : i32
    %c0_i32_0 = arith.constant 0 : i32
    %c0_i32_1 = arith.constant 0 : i32
    return %c0_i32, %c0_i32_0 : i32, i32
  }
  func.func @transform_4(%arg0: i32) -> (i32, i32) {
    %c0_i32 = arith.constant 0 : i32
    %c0_i32_0 = arith.constant 0 : i32
    %c0_i32_1 = arith.constant 0 : i32
    return %c0_i32, %c0_i32_0 : i32, i32
  }
  func.func @transform_5(%arg0: i32) -> (i32, i32) {
    %c0_i32 = arith.constant 0 : i32
    %c0_i32_0 = arith.constant 0 : i32
    %c0_i32_1 = arith.constant 0 : i32
    return %c0_i32, %c0_i32_0 : i32, i32
  }
  func.func @transform_6(%arg0: i32) -> (i32, i32) {
    %c0_i32 = arith.constant 0 : i32
    %c0_i32_0 = arith.constant 0 : i32
    %c0_i32_1 = arith.constant 0 : i32
    return %c0_i32, %c0_i32_0 : i32, i32
  }
  func.func @transform_7(%arg0: i32) -> (i32, i32) {
    %c0_i32 = arith.constant 0 : i32
    %c0_i32_0 = arith.constant 0 : i32
    return %arg0, %c0_i32 : i32, i32
  }
}

</mosaic_0001>

<bundles_post_ra>
// kernel: a2c_net_forward.1
= control target key start
LH: loop header
LB: loop body
LE: loop exit
PB: predicated region body
PF: predicated region fallthrough
CT: control target
= control target key end

     0   :  { %v547_v0 = vmov 0.0|0.0   ;;  %vm548_vm0 = vmmov 0   ;;  %v549_v4 = vmov 0.0   ;;  %s779_s1 = inlined_call_operand.vmem [shape: f32[128,128], index: 1, kind: input, shape index: {}]   ;;  %s780_s3 = inlined_call_operand.vmem [shape: f32[128,128], index: 3, kind: input, shape index: {}]   ;;  %s781_s0 = inlined_call_operand.vmem [shape: f32[8,128], index: 0, kind: input, shape index: {}]   ;;  %s782_s5 = inlined_call_operand.vmem [shape: f32[128,128], index: 5, kind: input, shape index: {}]   ;;  %s783_s2 = inlined_call_operand.vmem [shape: f32[1,128], index: 2, kind: input, shape index: {}]   ;;  %s784_s4 = inlined_call_operand.vmem [shape: f32[1,128], index: 4, kind: input, shape index: {}]   ;;  %s785_s6 = inlined_call_operand.vmem [shape: f32[1,128], index: 6, kind: input, shape index: {}]   ;;  %s786_s7 = inlined_call_operand.vmem [shape: f32[8,128], index: 7, kind: output, shape index: {}]  }
   0x1   :  { %472 = vmatprep.subr.bf16.mxu0 %v547_v0  ;;  %v27_v1 = vld [vmem:[%s779_s1] sm:$0xff]  ;;  %v28_v2 = vld [vmem:[%s779_s1 + $0x8] sm:$0xff]  ;;  %v29_v3 = vld [vmem:[%s779_s1 + $0x10] sm:$0xff]  ;;  %399 = vmatprep.mubr.msk.f32.mxu0 %vm548_vm0, %v549_v4 }
   0x2   :  { %v473_v5 = vpack.c.bf16 %v28_v2, %v27_v1  ;;  %v30_v6 = vld [vmem:[%s779_s1 + $0x18] sm:$0xff]  ;;  %496 = vmatprep.subr.bf16.mxu1 %v547_v0  ;;  %434 = vmatprep.mubr.msk.f32.mxu1 %vm548_vm0, %v549_v4  ;;  %v31_v8 = vld [vmem:[%s779_s1 + $0x20] sm:$0xff]  ;;  %v32_v9 = vld [vmem:[%s779_s1 + $0x28] sm:$0xff] }
   0x3   :  { %v476_v7 = vpack.c.bf16 %v30_v6, %v29_v3  ;;  %v121_v10 = vld [vmem:[%s780_s3] sm:$0xff]  ;;  %v122_v11 = vld [vmem:[%s780_s3 + $0x8] sm:$0xff]  ;;  %v123_v12 = vld [vmem:[%s780_s3 + $0x10] sm:$0xff]  ;;  %v479_v14 = vpack.c.bf16 %v32_v9, %v31_v8 }
   0x4   :  { %474 = vmatpush3.bf16.msra.mxu0 %v473_v5  ;;  %v124_v13 = vld [vmem:[%s780_s3 + $0x18] sm:$0xff]  ;;  %v497_v15 = vpack.c.bf16 %v122_v11, %v121_v10  ;;  %v33_v16 = vld [vmem:[%s779_s1 + $0x30] sm:$0xff]  ;;  %v125_v19 = vld [vmem:[%s780_s3 + $0x20] sm:$0xff] }
   0x5   :  { %475 = vmatprep.subr.bf16.mxu0 %v547_v0  ;;  %v34_v17 = vld [vmem:[%s779_s1 + $0x38] sm:$0xff]  ;;  %v500_v18 = vpack.c.bf16 %v124_v13, %v123_v12  ;;  %v126_v20 = vld [vmem:[%s780_s3 + $0x28] sm:$0xff]  ;;  %v35_v22 = vld [vmem:[%s779_s1 + $0x40] sm:$0xff] }
   0x6   :  { %498 = vmatpush3.bf16.msra.mxu1 %v497_v15  ;;  %v482_v21 = vpack.c.bf16 %v34_v17, %v33_v16  ;;  %v36_v23 = vld [vmem:[%s779_s1 + $0x48] sm:$0xff]  ;;  %v503_v24 = vpack.c.bf16 %v126_v20, %v125_v19  ;;  %v127_v25 = vld [vmem:[%s780_s3 + $0x30] sm:$0xff]  ;;  %v128_v26 = vld [vmem:[%s780_s3 + $0x38] sm:$0xff] }
   0x7   :  { %499 = vmatprep.subr.bf16.mxu1 %v547_v0  ;;  %v485_v27 = vpack.c.bf16 %v36_v23, %v35_v22  ;;  %v37_v28 = vld [vmem:[%s779_s1 + $0x50] sm:$0xff]  ;;  %v38_v29 = vld [vmem:[%s779_s1 + $0x58] sm:$0xff]  ;;  %v506_v30 = vpack.c.bf16 %v128_v26, %v127_v25  ;;  %v129_v31 = vld [vmem:[%s780_s3 + $0x40] sm:$0xff] }
   0x8   :  { %477 = vmatpush3.bf16.msra.mxu0 %v476_v7  ;;  %v130_v32 = vld [vmem:[%s780_s3 + $0x48] sm:$0xff]  ;;  %v488_v33 = vpack.c.bf16 %v38_v29, %v37_v28  ;;  %v39_v34 = vld [vmem:[%s779_s1 + $0x60] sm:$0xff]  ;;  %v131_v37 = vld [vmem:[%s780_s3 + $0x50] sm:$0xff] }
   0x9   :  { %478 = vmatprep.subr.bf16.mxu0 %v547_v0  ;;  %v40_v35 = vld [vmem:[%s779_s1 + $0x68] sm:$0xff]  ;;  %v509_v36 = vpack.c.bf16 %v130_v32, %v129_v31  ;;  %v132_v38 = vld [vmem:[%s780_s3 + $0x58] sm:$0xff]  ;;  %v41_v40 = vld [vmem:[%s779_s1 + $0x70] sm:$0xff] }
   0xa   :  { %501 = vmatpush3.bf16.msra.mxu1 %v500_v18  ;;  %v491_v39 = vpack.c.bf16 %v40_v35, %v39_v34  ;;  %v42_v41 = vld [vmem:[%s779_s1 + $0x78] sm:$0xff]  ;;  %v512_v42 = vpack.c.bf16 %v132_v38, %v131_v37  ;;  %v133_v43 = vld [vmem:[%s780_s3 + $0x60] sm:$0xff]  ;;  %v134_v44 = vld [vmem:[%s780_s3 + $0x68] sm:$0xff] }
   0xb   :  { %502 = vmatprep.subr.bf16.mxu1 %v547_v0  ;;  %v494_v45 = vpack.c.bf16 %v42_v41, %v41_v40  ;;  %v515_v46 = vpack.c.bf16 %v134_v44, %v133_v43  ;;  %v26_v47 = vld [vmem:[%s781_s0] sm:$0xff]  ;;  %v135_v48 = vld [vmem:[%s780_s3 + $0x70] sm:$0xff]  ;;  %v136_v49 = vld [vmem:[%s780_s3 + $0x78] sm:$0xff] }
   0xc   :  { %480 = vmatpush3.bf16.msra.mxu0 %v479_v14  ;;  %v518_v50 = vpack.c.bf16 %v136_v49, %v135_v48  ;;  %v215_v51 = vld [vmem:[%s782_s5] sm:$0xff]  ;;  %v216_v52 = vld [vmem:[%s782_s5 + $0x8] sm:$0xff]  ;;  %v217_v53 = vld [vmem:[%s782_s5 + $0x10] sm:$0xff] }
   0xd   :  { %481 = vmatprep.subr.bf16.mxu0 %v547_v0  ;;  %v521_v54 = vpack.c.bf16 %v216_v52, %v215_v51  ;;  %v218_v55 = vld [vmem:[%s782_s5 + $0x18] sm:$0xff]  ;;  %v219_v57 = vld [vmem:[%s782_s5 + $0x20] sm:$0xff]  ;;  %v220_v58 = vld [vmem:[%s782_s5 + $0x28] sm:$0xff] }
   0xe   :  { %504 = vmatpush3.bf16.msra.mxu1 %v503_v24  ;;  %v524_v56 = vpack.c.bf16 %v218_v55, %v217_v53  ;;  %v527_v59 = vpack.c.bf16 %v220_v58, %v219_v57  ;;  %v221_v60 = vld [vmem:[%s782_s5 + $0x30] sm:$0xff]  ;;  %v222_v61 = vld [vmem:[%s782_s5 + $0x38] sm:$0xff]  ;;  %v223_v63 = vld [vmem:[%s782_s5 + $0x40] sm:$0xff] }
   0xf   :  { %505 = vmatprep.subr.bf16.mxu1 %v547_v0  ;;  %v530_v62 = vpack.c.bf16 %v222_v61, %v221_v60  ;;  %v224_v1 = vld [vmem:[%s782_s5 + $0x48] sm:$0xff]  ;;  %v225_v3 = vld [vmem:[%s782_s5 + $0x50] sm:$0xff]  ;;  %v227_v6 = vld [vmem:[%s782_s5 + $0x60] sm:$0xff] }
  0x10   :  { %483 = vmatpush3.bf16.msra.mxu0 %v482_v21  ;;  %v533_v2 = vpack.c.bf16 %v224_v1, %v223_v63  ;;  %v228_v7 = vld [vmem:[%s782_s5 + $0x68] sm:$0xff]  ;;  %v313_v9 = vld [vmem:[%s783_s2] ss:$0 sm:$0xff]  ;;  %v229_v14 = vld [vmem:[%s782_s5 + $0x70] sm:$0xff] }
  0x11   :  { %484 = vmatprep.subr.bf16.mxu0 %v547_v0  ;;  %v539_v8 = vpack.c.bf16 %v228_v7, %v227_v6  ;;  %v230_v15 = vld [vmem:[%s782_s5 + $0x78] sm:$0xff]  ;;  %v315_v21 = vld [vmem:[%s785_s6] ss:$0 sm:$0xff] }
  0x12   :  { %507 = vmatpush3.bf16.msra.mxu1 %v506_v30  ;;  %v542_v16 = vpack.c.bf16 %v230_v15, %v229_v14 }
  0x13   :  { %508 = vmatprep.subr.bf16.mxu1 %v547_v0 }
  0x14   :  { %486 = vmatpush3.bf16.msra.mxu0 %v485_v27 }
  0x15   :  { %487 = vmatprep.subr.bf16.mxu0 %v547_v0 }
  0x16   :  { %510 = vmatpush3.bf16.msra.mxu1 %v509_v36 }
  0x17   :  { %511 = vmatprep.subr.bf16.mxu1 %v547_v0 }
  0x18   :  { %489 = vmatpush3.bf16.msra.mxu0 %v488_v33 }
  0x19   :  { %490 = vmatprep.subr.bf16.mxu0 %v547_v0 }
  0x1a   :  { %513 = vmatpush3.bf16.msra.mxu1 %v512_v42 }
  0x1b   :  { %514 = vmatprep.subr.bf16.mxu1 %v547_v0 }
  0x1c   :  { %492 = vmatpush3.bf16.msra.mxu0 %v491_v39 }
  0x1d   :  { %493 = vmatprep.subr.bf16.mxu0 %v547_v0 }
  0x1e   :  { %516 = vmatpush3.bf16.msra.mxu1 %v515_v46 }
  0x1f   :  { %517 = vmatprep.subr.bf16.mxu1 %v547_v0 }
  0x20   :  { %495 = vmatpush3.bf16.msra.mxu0 %v494_v45 }
  0x21   :  { %520 = vmatprep.subr.bf16.mxu0 %v547_v0 }
  0x22   :  { %519 = vmatpush3.bf16.msra.mxu1 %v518_v50 }
  0x23   :  { %400 = vmatmul.mubr.f32.vlgmr.msra.gmra.mrb[0].mxu0 %v26_v47 }
  0x24   :  { %469 = vmatprep.mubr.msk.f32.mxu0 %vm548_vm0, %v549_v4  ;;  %522 = vmatpush3.bf16.msra.mxu0 %v521_v54  ;;  %v226_v4 = vld [vmem:[%s782_s5 + $0x58] sm:$0xff] }
  0x25   :  { %523 = vmatprep.subr.bf16.mxu0 %v547_v0  ;;  %v536_v5 = vpack.c.bf16 %v226_v4, %v225_v3 }
  0x28   :  { %525 = vmatpush3.bf16.msra.mxu0 %v524_v56 }
  0x29   :  { %526 = vmatprep.subr.bf16.mxu0 %v547_v0 }
  0x2c   :  { %528 = vmatpush3.bf16.msra.mxu0 %v527_v59 }
  0x2d   :  { %529 = vmatprep.subr.bf16.mxu0 %v547_v0 }
  0x30   :  { %531 = vmatpush3.bf16.msra.mxu0 %v530_v62 }
  0x31   :  { %532 = vmatprep.subr.bf16.mxu0 %v547_v0 }
  0x34   :  { %534 = vmatpush3.bf16.msra.mxu0 %v533_v2 }
  0x35   :  { %535 = vmatprep.subr.bf16.mxu0 %v547_v0 }
  0x38   :  { %537 = vmatpush3.bf16.msra.mxu0 %v536_v5 }
  0x39   :  { %538 = vmatprep.subr.bf16.mxu0 %v547_v0 }
  0x3c   :  { %540 = vmatpush3.bf16.msra.mxu0 %v539_v8 }
  0x3d   :  { %541 = vmatprep.subr.bf16.mxu0 %v547_v0  ;;  %v314_v0 = vld [vmem:[%s784_s4] ss:$0 sm:$0xff] }
  0x40   :  { %543 = vmatpush3.bf16.msra.mxu0 %v542_v16 }
  0xf6   :  { %v116_v10 = vpop.f32.mrb[0].mxu0 }
  0xf7   :  { %v117_v11 = vadd.f32 %v313_v9, %v116_v10  ;;  %v401_v12 = vpop.f32.mrb[1].mxu0 }
  0xf9   :  { %v120_v13 = vmax.f32 %v117_v11, 0.0 }
  0xfb   :  { %435 = vmatmul.mubr.f32.vlgmr.msra.gmra.mrb[0].mxu1 %v120_v13 }
 0x1ce   :  { %v210_v17 = vpop.f32.mrb[0].mxu1 }
 0x1cf   :  { %v211_v18 = vadd.f32 %v314_v0, %v210_v17  ;;  %v436_v19 = vpop.f32.mrb[1].mxu1 }
 0x1d1   :  { %v214_v20 = vmax.f32 %v211_v18, 0.0 }
 0x1d3   :  { %470 = vmatmul.mubr.f32.vlgmr.msra.gmra.mrb[2].mxu0 %v214_v20 }
 0x2a6   :  { %v304_v22 = vpop.f32.mrb[2].mxu0 }
 0x2a7   :  { %v305_v23 = vadd.f32 %v315_v21, %v304_v22  ;;  %v471_v24 = vpop.f32.mrb[3].mxu0 }
 0x2a9   :  { %308 = vst [vmem:[%s786_s7] sm:$0xff] %v305_v23 }

</bundles_post_ra>
